<compile_context>
chip_gen: v7x
topology: tpu7x:2x2x1
jax: 0.10.0
libtpu: 0.0.40
codegen_flags: <defaults>
</compile_context>

<pallas_src>
import jax
import jax.numpy as jnp
from jax.experimental import pallas as pl
from jax.experimental.pallas import tpu as pltpu

EPS = 1e-6


def _vmem_budgets():
    """Generation-aware (data_budget_bytes, vmem_limit_bytes).

    data_budget covers the double-buffered input + output tiles; the limit
    leaves headroom for in-kernel f32 temporaries and Mosaic internal scratch.
    v7x has 64 MiB VMEM per TensorCore; v5e/v6e have 128 MiB.
    """
    try:
        vmem = int(pltpu.get_tpu_info().vmem_capacity_bytes)
    except Exception:  # interpret mode / unknown chip -> conservative default
        vmem = 64 * 1024 * 1024
    if vmem <= 64 * 1024 * 1024:                       # v7x
        return 10 * 1024 * 1024, 36 * 1024 * 1024
    return 28 * 1024 * 1024, 80 * 1024 * 1024          # v5e / v6e


def layernorm_kernel(alpha_ref, bias_ref, x_ref, o_ref):
    # x_ref: (TR, H) tile in VMEM; alpha_ref / bias_ref: (1,) scalars in SMEM.
    x = x_ref[...].astype(jnp.float32)
    n = x.shape[-1]

    mean = jnp.mean(x, axis=-1, keepdims=True)
    # Two-pass unbiased variance (torch.std parity); `d` is only a transient
    # operand of the XLU reduction, not part of the store path.
    d = x - mean
    var = jnp.sum(d * d, axis=-1, keepdims=True) * (1.0 / max(n - 1, 1))
    std = jnp.sqrt(var)

    # Per-row scale/offset (TR, 1): alpha and -scale*mean folded in so the
    # per-element output pass is a single multiply-add on the VPU.
    scale = alpha_ref[0] / (std + EPS)
    offset = bias_ref[0] - scale * mean
    o_ref[...] = (x * scale + offset).astype(o_ref.dtype)


def _choose_row_tile(rows, h, dtype, data_budget):
    """Pick a row tile: as large as the double-buffered (in + out) data budget
    allows, aligned to the dtype's sublane packing, but split so the grid has
    >= 4 steps whenever each block can stay >= ~1 MiB."""
    itemsize = jnp.dtype(dtype).itemsize
    mult = 8 if itemsize >= 4 else (16 if itemsize == 2 else 32)
    row_bytes = h * itemsize

    def rup(v, m):
        return -(-v // m) * m

    rows_up = rup(rows, mult)

    # Largest tile under the budget: 2 buffers x (input + output) per row.
    max_tile = max(mult, (data_budget // max(4 * row_bytes, 1)) // mult * mult)
    tile = min(max_tile, rows_up)

    # Target >= 4 grid steps (>= 2 per v7x TensorCore; >= 4 pipeline stages on
    # v5e/v6e) as long as each block keeps >= ~1 MiB of data.
    min_split_tile = max(mult, ((1 << 20) // max(row_bytes, 1)) // mult * mult)
    quarter = max(mult, rup(-(-rows_up // 4), mult))
    if quarter >= min_split_tile:
        tile = min(tile, quarter)
    return int(max(mult, tile))


def layer_normalization(x, alpha, bias, *, row_tile=None):
    """x: (..., H). alpha, bias: shape (1,) scalar params."""
    orig_shape = x.shape
    h = orig_shape[-1]
    x2 = x.reshape(-1, h)
    rows = x2.shape[0]

    data_budget, vmem_limit = _vmem_budgets()
    if row_tile is None:
        row_tile = _choose_row_tile(rows, h, x2.dtype, data_budget)
    grid = pl.cdiv(rows, row_tile)

    out = pl.pallas_call(
        layernorm_kernel,
        out_shape=jax.ShapeDtypeStruct((rows, h), x.dtype),
        grid_spec=pltpu.PrefetchScalarGridSpec(
            num_scalar_prefetch=0,
            grid=(grid,),
            in_specs=[
                pl.BlockSpec(memory_space=pltpu.SMEM),  # alpha (1,)
                pl.BlockSpec(memory_space=pltpu.SMEM),  # bias  (1,)
                pl.BlockSpec((row_tile, h), lambda i: (i, 0)),
            ],
            out_specs=pl.BlockSpec((row_tile, h), lambda i: (i, 0)),
        ),
        compiler_params=pltpu.CompilerParams(
            dimension_semantics=("parallel",),
            vmem_limit_bytes=vmem_limit,
        ),
    )(alpha.astype(jnp.float32), bias.astype(jnp.float32), x2)

    return out.reshape(orig_shape)


def decoder_forward(x, encoder_output, src_mask, tgt_mask, layers=(), *, alpha, bias):
    """Decoder.forward: run the layer stack, then the final LayerNormalization."""
    # TODO(synk): the Decoder's layer stack (nn.ModuleList of decoder blocks) is
    # supplied externally in the PyTorch spec; any provided JAX layer callables
    # are applied here, the only intrinsic compute is the final LayerNorm kernel.
    for layer in layers:
        x = layer(x, encoder_output, src_mask, tgt_mask)
    return layer_normalization(x, alpha, bias)


if __name__ == "__main__":
    key = jax.random.PRNGKey(0)
    kx, ke = jax.random.split(key)

    # forward implies (batch, seq, hidden) tensors; use (2, 8, 32)
    B, S, H = 2, 8, 32
    x = jax.random.normal(kx, (B, S, H), dtype=jnp.float32)
    encoder_output = jax.random.normal(ke, (B, S, H), dtype=jnp.float32)
    src_mask = jnp.ones((B, 1, 1, S), dtype=jnp.float32)
    tgt_mask = jnp.tril(jnp.ones((S, S), dtype=jnp.float32))[None, None, :, :]

    # deterministic params matching nn.Parameter(torch.ones(1)/zeros(1))
    alpha = jnp.ones((1,), dtype=jnp.float32)
    bias = jnp.zeros((1,), dtype=jnp.float32)

    out = decoder_forward(x, encoder_output, src_mask, tgt_mask, layers=(),
                          alpha=alpha, bias=bias)
    out = jax.block_until_ready(out)

    # reference check in plain JAX (unbiased std, matching torch.std default)
    mean = jnp.mean(x, axis=-1, keepdims=True)
    std = jnp.std(x, axis=-1, keepdims=True, ddof=1)
    ref = alpha * (x - mean) / (std + EPS) + bias
    assert jnp.allclose(out, ref, atol=1e-5, rtol=1e-5)

    print("KERNEL_OK")
</pallas_src>

<mosaic_0001>
module attributes {stable_mosaic.version = 11 : i64} {
  func.func @layernorm_kernel(%arg0: i32, %arg1: memref<1xf32, #tpu.memory_space<smem>>, %arg2: memref<1xf32, #tpu.memory_space<smem>>, %arg3: memref<16x32xf32, #tpu.memory_space<vmem>>, %arg4: memref<16x32xf32, #tpu.memory_space<vmem>>) attributes {dimension_semantics = [#tpu.dimension_semantics<parallel>], iteration_bounds = array<i64: 1>, scalar_prefetch = 0 : i64, scratch_operands = 0 : i64, tpu.core_type = #tpu.core_type<tc>, window_params = [{transform_indices = @transform_0, window_bounds = array<i64: 1>}, {transform_indices = @transform_1, window_bounds = array<i64: 1>}, {transform_indices = @transform_2, window_bounds = array<i64: 16, 32>}, {transform_indices = @transform_3, window_bounds = array<i64: 16, 32>}]} {
    %c0 = arith.constant 0 : index
    %c0_0 = arith.constant 0 : index
    %0 = vector.load %arg3[%c0, %c0_0] : memref<16x32xf32, #tpu.memory_space<vmem>>, vector<16x32xf32>
    %cst = arith.constant dense<0.000000e+00> : vector<16xf32>
    %1 = vector.multi_reduction <add>, %0, %cst [1] : vector<16x32xf32> to vector<16xf32>
    %2 = vector.shape_cast %1 : vector<16xf32> to vector<16x1xf32>
    %cst_1 = arith.constant 3.200000e+01 : f32
    %3 = vector.broadcast %cst_1 : f32 to vector<16x1xf32>
    %4 = arith.divf %2, %3 : vector<16x1xf32>
    %5 = vector.broadcast %4 : vector<16x1xf32> to vector<16x32xf32>
    %6 = arith.subf %0, %5 : vector<16x32xf32>
    %7 = arith.mulf %6, %6 : vector<16x32xf32>
    %cst_2 = arith.constant dense<0.000000e+00> : vector<16xf32>
    %8 = vector.multi_reduction <add>, %7, %cst_2 [1] : vector<16x32xf32> to vector<16xf32>
    %9 = vector.shape_cast %8 : vector<16xf32> to vector<16x1xf32>
    %cst_3 = arith.constant 0.0322580636 : f32
    %10 = vector.broadcast %cst_3 : f32 to vector<16x1xf32>
    %11 = arith.mulf %9, %10 : vector<16x1xf32>
    %12 = math.sqrt %11 : vector<16x1xf32>
    %c0_4 = arith.constant 0 : index
    %13 = memref.load %arg1[%c0_4] : memref<1xf32, #tpu.memory_space<smem>>
    %cst_5 = arith.constant 9.99999997E-7 : f32
    %14 = vector.broadcast %cst_5 : f32 to vector<16x1xf32>
    %15 = arith.addf %12, %14 : vector<16x1xf32>
    %16 = vector.broadcast %13 : f32 to vector<16x1xf32>
    %17 = arith.divf %16, %15 : vector<16x1xf32>
    %c0_6 = arith.constant 0 : index
    %18 = memref.load %arg2[%c0_6] : memref<1xf32, #tpu.memory_space<smem>>
    %19 = arith.mulf %17, %4 : vector<16x1xf32>
    %20 = vector.broadcast %18 : f32 to vector<16x1xf32>
    %21 = arith.subf %20, %19 : vector<16x1xf32>
    %22 = vector.broadcast %17 : vector<16x1xf32> to vector<16x32xf32>
    %23 = arith.mulf %0, %22 : vector<16x32xf32>
    %24 = vector.broadcast %21 : vector<16x1xf32> to vector<16x32xf32>
    %25 = arith.addf %23, %24 : vector<16x32xf32>
    %c0_7 = arith.constant 0 : index
    %c0_8 = arith.constant 0 : index
    %26 = vector.load %arg4[%c0_7, %c0_8] : memref<16x32xf32, #tpu.memory_space<vmem>>, vector<16x32xf32>
    tpu.vector_store %arg4[%c0_7, %c0_8], %25 {strides = array<i32>} : memref<16x32xf32, #tpu.memory_space<vmem>>, vector<16x32xf32>,
    return
  }
  func.func @transform_0(%arg0: i32) -> i32 {
    %c0_i32 = arith.constant 0 : i32
    %c0_i32_0 = arith.constant 0 : i32
    return %c0_i32 : i32
  }
  func.func @transform_1(%arg0: i32) -> i32 {
    %c0_i32 = arith.constant 0 : i32
    %c0_i32_0 = arith.constant 0 : i32
    return %c0_i32 : i32
  }
  func.func @transform_2(%arg0: i32) -> (i32, i32) {
    %c0_i32 = arith.constant 0 : i32
    %c0_i32_0 = arith.constant 0 : i32
    return %arg0, %c0_i32 : i32, i32
  }
  func.func @transform_3(%arg0: i32) -> (i32, i32) {
    %c0_i32 = arith.constant 0 : i32
    %c0_i32_0 = arith.constant 0 : i32
    return %arg0, %c0_i32 : i32, i32
  }
}

</mosaic_0001>

<bundles_post_ra>
// kernel: tpu_custom_call.1
= control target key start
LH: loop header
LB: loop body
LE: loop exit
PB: predicated region body
PF: predicated region fallthrough
CT: control target
= control target key end

     0   :  { %10 = vsyncpa [#allocation5], 0  ;;  %s232_s0 = inlined_call_operand.<no memory space> [shape: f32[1], index: 0, kind: input, shape index: {}]   ;;  %s233_s1 = inlined_call_operand.<no memory space> [shape: f32[1], index: 1, kind: input, shape index: {}]   ;;  %s234_s2 = inlined_call_operand.hbm [shape: f32[16,32], index: 2, kind: input, shape index: {}]   ;;  %s235_s3 = inlined_call_operand.hbm [shape: f32[16,32], index: 3, kind: output, shape index: {}]  }
   0x1   :  { %11 = vsyncpa [#allocation6], 0  ;;  %s166_s12 = smov [#allocation4]   ;;  %s118_s16 = scalar_lea.hbm %s234_s2, 256 }
   0x2   :  { %s21_s13 = sshll.u32 %s166_s12, 4  ;;  %p119_p0 = scmp.ne.s32.totalorder %s234_s2, %s118_s16  ;;  %s22_s13 = int_to_ptr.vmem [resolvable:$true] %s21_s13 }
   0x3   :  { %p122_p1 = scmp.lt.u32.totalorder %s118_s16, %s234_s2 }
   0x5   :  { %p124_p2 = pnand %p122_p1, %p119_p0 }
   0x7   :  { %127 = shalt.err (!%p124_p2)
}
   0x8   :  { %s128_s21 = scalar_lea.vmem %s22_s13, 256  ;;  %p133_p4 = scmp.lt.s32.totalorder %s22_s13, %s22_s13 }
   0x9   :  { %p129_p3 = scmp.ne.s32.totalorder %s22_s13, %s128_s21  ;;  %p134_p5 = scmp.lt.s32.totalorder %s128_s21, %s128_s21 }
   0xb   :  { %p135_p6 = por %p134_p5, %p133_p4 }
   0xd   :  { %p136_p7 = pnand %p135_p6, %p129_p3 }
   0xf   :  { %139 = shalt.err (!%p136_p7)
}
  0x10   :  { %s167_s22 = smov 128   ;;  %s168_s23 = smov 8  }
  0x11   :  { %27 = dma.hbm_to_vmem [thread:$0]  %s234_s2, 256, %s22_s13, [#allocation5], %s167_s22, %s167_s22, %s168_s23  }
  0x12   :  { %162 = dma.done.wait [#allocation5], 256  }
  0x13   :  { %163 = vsyncadd [#allocation5], 4294967040  ;;  %vm33_vm0 = vcmask 261120   ;;  %v31_v0 = vld [vmem:[#allocation4] sm:$0xff]  ;;  %v32_v1 = vld [vmem:[#allocation4 + $0x8] sm:$0xff]  ;;  %v72_v30 = vstv %s232_s0  ;;  %v80_v33 = vstv %s233_s1  ;;  %s169_s29 = smov [#allocation7]  }
  0x14   :  { %v34_v2 = vsel %vm33_vm0, %v31_v0, 0.0  ;;  %v37_v3 = vsel %vm33_vm0, %v32_v1, 0.0  ;;  %s94_s30 = sshll.u32 %s169_s29, 4  ;;  %s95_s30 = int_to_ptr.vmem [resolvable:$true] %s94_s30 }
  0x15   :  { %35 = vadd.xlane.f32.xlu0 %v34_v2  ;;  %s140_s0 = scalar_lea.vmem %s95_s30, 256  ;;  %p145_p9 = scmp.lt.s32.totalorder %s95_s30, %s95_s30 }
  0x16   :  { %p141_p8 = scmp.ne.s32.totalorder %s95_s30, %s140_s0  ;;  %p146_p10 = scmp.lt.s32.totalorder %s140_s0, %s140_s0 }
  0x18   :  { %p147_p11 = por %p146_p10, %p145_p9 }
  0x19   :  { %38 = vadd.xlane.f32.xlu0 %v37_v3 }
  0x1a   :  { %p148_p12 = pnand %p147_p11, %p141_p8 }
  0xa2   :  { %v36_v4 = vpop.xlane.xlu0 %35 }
  0xa3   :  { %v41_v5 = vmul.f32 0.03125, %v36_v4 }
  0xa5   :  { %v43_v6 = vsub.f32 %v31_v0, %v41_v5 }
  0xa6   :  { %v39_v7 = vpop.xlane.xlu0 %38 }
  0xa7   :  { %v42_v8 = vmul.f32 0.03125, %v39_v7  ;;  %v45_v9 = vmul.f32 %v43_v6, %v43_v6 }
  0xa9   :  { %v44_v10 = vsub.f32 %v32_v1, %v42_v8  ;;  %v47_v11 = vsel %vm33_vm0, %v45_v9, 0.0 }
  0xaa   :  { %48 = vadd.xlane.f32.xlu1 %v47_v11 }
  0xab   :  { %v46_v12 = vmul.f32 %v44_v10, %v44_v10 }
  0xad   :  { %v50_v13 = vsel %vm33_vm0, %v46_v12, 0.0 }
  0xae   :  { %51 = vadd.xlane.f32.xlu1 %v50_v13 }
 0x137   :  { %v49_v14 = vpop.xlane.xlu1 %48 }
 0x138   :  { %v53_v15 = vmul.f32 0.032258064, %v49_v14 }
 0x13a   :  { %110 = vrsqrt.f32 %v53_v15  ;;  %vm57_vm1 = vcmp.eq.f32.partialorder %v53_v15, inf  ;;  %v60_v20 = vand.u32 2147483648, %v53_v15  ;;  %vm59_vm2 = vcmp.eq.f32.partialorder %v53_v15, 0.0 }
 0x13b   :  { %v52_v16 = vpop.xlane.xlu1 %51 }
 0x13c   :  { %v54_v17 = vmul.f32 0.032258064, %v52_v16 }
 0x13e   :  { %112 = vrsqrt.f32 %v54_v17  ;;  %vm64_vm3 = vcmp.eq.f32.partialorder %v54_v17, inf  ;;  %v67_v26 = vand.u32 2147483648, %v54_v17  ;;  %vm66_vm4 = vcmp.eq.f32.partialorder %v54_v17, 0.0 }
 0x144   :  { %v111_v18 = vpop.eup %110 }
 0x145   :  { %v56_v19 = vmul.f32 %v111_v18, %v53_v15 }
 0x147   :  { %v58_v21 = vsel %vm57_vm1, %v53_v15, %v56_v19 }
 0x148   :  { %v113_v22 = vpop.eup %112  ;;  %v61_v23 = vsel %vm59_vm2, %v60_v20, %v58_v21 }
 0x149   :  { %v70_v24 = vadd.f32 1e-06, %v61_v23  ;;  %v63_v25 = vmul.f32 %v113_v22, %v54_v17 }
 0x14b   :  { %114 = vrcp.f32 %v70_v24  ;;  %v65_v27 = vsel %vm64_vm3, %v54_v17, %v63_v25 }
 0x14c   :  { %v68_v28 = vsel %vm66_vm4, %v67_v26, %v65_v27 }
 0x14d   :  { %v71_v29 = vadd.f32 1e-06, %v68_v28 }
 0x14f   :  { %116 = vrcp.f32 %v71_v29 }
 0x155   :  { %v115_v31 = vpop.eup %114 }
 0x156   :  { %v74_v32 = vmul.f32 %v115_v31, %v72_v30 }
 0x158   :  { %v78_v34 = vmul.f32 %v74_v32, %v41_v5  ;;  %v83_v38 = vmul.f32 %v74_v32, %v31_v0 }
 0x159   :  { %v117_v35 = vpop.eup %116 }
 0x15a   :  { %v76_v36 = vmul.f32 %v117_v35, %v72_v30  ;;  %v81_v37 = vsub.f32 %v80_v33, %v78_v34 }
 0x15c   :  { %v79_v39 = vmul.f32 %v76_v36, %v42_v8  ;;  %v85_v40 = vadd.f32 %v83_v38, %v81_v37  ;;  %v84_v42 = vmul.f32 %v76_v36, %v32_v1 }
 0x15e   :  { %v82_v41 = vsub.f32 %v80_v33, %v79_v39  ;;  %87 = vst.msk [vmem:[#allocation7] sm:$0xff] %vm33_vm0, %v85_v40 }
 0x160   :  { %v86_v43 = vadd.f32 %v84_v42, %v82_v41 }
 0x162   :  { %88 = vst.msk [vmem:[#allocation7 + $0x8] sm:$0xff] %vm33_vm0, %v86_v43 }
 0x163   :  { %151 = shalt.err (!%p148_p12)
}
 0x164   :  { %s152_s5 = scalar_lea.hbm %s235_s3, 256 }
 0x165   :  { %p153_p13 = scmp.ne.s32.totalorder %s235_s3, %s152_s5  ;;  %p156_p0 = scmp.lt.u32.totalorder %s152_s5, %s235_s3 }
 0x167   :  { %p158_p1 = pnand %p156_p0, %p153_p13 }
 0x169   :  { %161 = shalt.err (!%p158_p1)
}
 0x16a   :  { %100 = dma.vmem_to_hbm [thread:$0]  %s95_s30, 256, %s235_s3, [#allocation6], %s167_s22, %s167_s22, %s168_s23  }
 0x16b   :  { %164 = dma.done.wait [#allocation6], 256  }
 0x16c   :  { %165 = vsyncadd [#allocation6], 4294967040 }
 0x16d   :  { %104 = vsyncpa [#allocation5], 1 }
 0x16e   :  { %105 = vsyncpa [#allocation6], 1 }

</bundles_post_ra>
